<compile_context>
chip_gen: v5e
topology: v5e:2x2
jax: 0.10.0
libtpu: 0.0.40
codegen_flags: <defaults>
</compile_context>

<pallas_src>
import json
from functools import partial

import jax
import jax.numpy as jnp
from jax.experimental import pallas as pl
from jax.experimental.pallas import tpu as pltpu


# ----------------------------------------------------------------------------
# helpers
# ----------------------------------------------------------------------------
_MAX_DMA_CHUNKS = 8                    # max concurrent HBM->HBM DMAs
_MIN_CHUNK_BYTES = 4 * 1024 * 1024     # don't split transfers below ~4 MiB
_COLS = 8 * 128                        # 1024: lane-dense slab width (fallback)
_BLOCK_BYTES = 8 * 1024 * 1024         # fallback tile: 8 MiB per buffer


def _round_up(x: int, m: int) -> int:
    return ((x + m - 1) // m) * m


def _sublane_multiple(dtype) -> int:
    """Dtype-dependent minimum sublane tiling: f32 -> 8, bf16 -> 16, i8 -> 32."""
    itemsize = jnp.dtype(dtype).itemsize
    return {4: 8, 2: 16, 1: 32}.get(itemsize, 8)


# ----------------------------------------------------------------------------
# Primary path: chunked HBM->HBM DMA copy (no VMEM staging)
# ----------------------------------------------------------------------------
def _chunk_plan(total: int, itemsize: int, min_chunk_bytes: int, max_chunks: int):
    """Split [0, total) into up to max_chunks contiguous, mostly-aligned chunks."""
    nbytes = total * itemsize
    n = int(min(max_chunks, max(1, nbytes // max(1, min_chunk_bytes))))
    chunk = -(-total // n)
    if n > 1:
        chunk = _round_up(chunk, 1024)  # keep interior chunk boundaries aligned
    offsets, sizes = [], []
    off = 0
    while off < total:
        sz = min(chunk, total - off)
        offsets.append(off)
        sizes.append(sz)
        off += sz
    return tuple(offsets), tuple(sizes)


def _make_dma_copy_kernel(offsets, sizes):
    n = len(offsets)

    def kernel(x_hbm, o_hbm, sems):
        # Issue every chunk DMA (each has its own semaphore -> they run
        # concurrently on the DMA engines), then wait for all of them.
        copies = [
            pltpu.make_async_copy(
                x_hbm.at[pl.ds(offsets[c], sizes[c])],
                o_hbm.at[pl.ds(offsets[c], sizes[c])],
                sems.at[c],
            )
            for c in range(n)
        ]
        for cp in copies:
            cp.start()
        for cp in copies:
            cp.wait()

    return kernel


@partial(jax.jit, static_argnames=("min_chunk_bytes", "max_chunks"))
def _dma_passthrough(x, *, min_chunk_bytes=_MIN_CHUNK_BYTES,
                     max_chunks=_MAX_DMA_CHUNKS):
    """Materializing identity copy via direct HBM->HBM DMA."""
    orig_shape = x.shape
    total = int(x.size)
    itemsize = jnp.dtype(x.dtype).itemsize
    nbytes = total * itemsize

    x_flat = x.reshape(-1)  # free bitcast under jit
    offsets, sizes = _chunk_plan(total, itemsize, min_chunk_bytes, max_chunks)

    y_flat = pl.pallas_call(
        _make_dma_copy_kernel(offsets, sizes),
        out_shape=jax.ShapeDtypeStruct((total,), x.dtype),
        in_specs=[pl.BlockSpec(memory_space=pl.ANY)],
        out_specs=pl.BlockSpec(memory_space=pl.ANY),
        scratch_shapes=[pltpu.SemaphoreType.DMA((len(offsets),))],
        cost_estimate=pl.CostEstimate(
            flops=0, transcendentals=0, bytes_accessed=2 * nbytes),
    )(x_flat)

    return y_flat.reshape(orig_shape)


# ----------------------------------------------------------------------------
# Fallback path: lane-dense tiled copy staged through VMEM
# ----------------------------------------------------------------------------
def _identity_tile_kernel(x_ref, o_ref):
    o_ref[...] = x_ref[...]


@jax.jit
def _tiled_passthrough(x):
    orig_shape = x.shape
    dtype = x.dtype
    total = int(x.size)
    itemsize = jnp.dtype(dtype).itemsize
    sub = _sublane_multiple(dtype)

    cols = _COLS
    rows = -(-total // cols)
    tile_rows = max(sub, (_BLOCK_BYTES // (cols * itemsize)) // sub * sub)
    if rows <= tile_rows:
        tile_rows = rows  # single full-extent block (always a legal block shape)

    padded_total = rows * cols
    x_flat = x.reshape(-1)
    if padded_total != total:
        # TODO(synk): tail pad only exists on this fallback path; the primary
        # HBM->HBM DMA path handles odd element counts with zero extra traffic.
        x_flat = jnp.pad(x_flat, (0, padded_total - total))
    x2d = x_flat.reshape(rows, cols)

    nbytes = total * itemsize
    y2d = pl.pallas_call(
        _identity_tile_kernel,
        out_shape=jax.ShapeDtypeStruct((rows, cols), dtype),
        grid=(pl.cdiv(rows, tile_rows),),   # edge block masked, no row padding
        in_specs=[pl.BlockSpec((tile_rows, cols), lambda i: (i, 0))],
        out_specs=pl.BlockSpec((tile_rows, cols), lambda i: (i, 0)),
        compiler_params=pltpu.CompilerParams(
            dimension_semantics=("parallel",),
            vmem_limit_bytes=48 * 1024 * 1024,
        ),
        cost_estimate=pl.CostEstimate(
            flops=0, transcendentals=0, bytes_accessed=2 * nbytes),
    )(x2d)

    y_flat = y2d.reshape(-1)
    if padded_total != total:
        y_flat = y_flat[:total]
    return y_flat.reshape(orig_shape)


# ----------------------------------------------------------------------------
# dispatcher
# ----------------------------------------------------------------------------
_DMA_PATH_OK = True


def _materialized_copy(x, *, min_chunk_bytes=_MIN_CHUNK_BYTES,
                       max_chunks=_MAX_DMA_CHUNKS):
    """Identity copy into a new buffer via a Pallas kernel."""
    global _DMA_PATH_OK
    if x.size == 0:
        return x
    if _DMA_PATH_OK:
        try:
            return _dma_passthrough(
                x, min_chunk_bytes=min_chunk_bytes, max_chunks=max_chunks)
        except Exception:
            # HBM->HBM DMA not available in this environment; use the
            # VMEM-staged tiled copy instead.
            _DMA_PATH_OK = False
    return _tiled_passthrough(x)


# ----------------------------------------------------------------------------
# JAX-side BaseModel equivalent
# ----------------------------------------------------------------------------
class BaseModelJAX:
    """JAX/Pallas equivalent of flagai BaseModel.

    Holds a config dict; owns no parameters.  `forward` raises
    NotImplementedError (faithful to the reference); `passthrough` is the only
    concrete data path: by default it is a free no-op, and with
    materialize=True it runs the Pallas HBM->HBM copy kernel.
    """

    def __init__(self, config, **kwargs):
        self.config = dict(config)

    def forward(self, **kwargs):
        raise NotImplementedError("base model is not callable!")

    def __call__(self, **kwargs):
        return self.forward(**kwargs)

    def passthrough(self, x: jax.Array, materialize: bool = False) -> jax.Array:
        if not materialize:
            # Identity is free: no kernel, no HBM round trip.
            return x
        return _materialized_copy(x)

    # TODO(synk): load_weights/save_weights/from_pretrain/init_from_json are
    # checkpoint/file-IO and model-hub utilities with no Pallas equivalent;
    # omitted (no file or network access).
    def save_config(self):
        return json.dumps(self.config, indent=4)

    @classmethod
    def init_from_config(cls, config_dict, **kwargs):
        args = dict(config_dict)
        for k in kwargs:
            args[k] = kwargs[k]
        if "checkpoint_activations" not in args:
            args["checkpoint_activations"] = False
        return cls(args, **kwargs)


if __name__ == "__main__":
    key = jax.random.PRNGKey(0)
    x = jax.random.normal(key, (2, 4, 16, 16), dtype=jnp.float32)  # NCHW

    model = BaseModelJAX.init_from_config({"model_type": "base", "hidden_size": 32})

    # The reference forward is abstract; verify that contract is preserved.
    try:
        model()
        raise AssertionError("forward() should have raised")
    except NotImplementedError:
        pass

    # 1) Default pass-through short-circuits (no kernel, no copy).
    y0 = model.passthrough(x)
    assert y0 is x

    # 2) Materialized copy runs the Pallas HBM->HBM DMA kernel.
    y = model.passthrough(x, materialize=True)
    jax.block_until_ready(y)
    assert y.shape == x.shape and y.dtype == x.dtype
    assert bool(jnp.all(y == x))

    # bf16 input (different itemsize / packing).
    x_bf16 = jax.random.normal(key, (2, 8, 32, 32), dtype=jnp.bfloat16)
    y_bf16 = model.passthrough(x_bf16, materialize=True)
    jax.block_until_ready(y_bf16)
    assert y_bf16.shape == x_bf16.shape and y_bf16.dtype == x_bf16.dtype
    assert bool(jnp.all(y_bf16 == x_bf16))

    # Odd element count: no padding / slicing on the DMA path.
    x_odd = jax.random.normal(key, (3, 5, 7, 9), dtype=jnp.float32)
    y_odd = model.passthrough(x_odd, materialize=True)
    jax.block_until_ready(y_odd)
    assert y_odd.shape == x_odd.shape and y_odd.dtype == x_odd.dtype
    assert bool(jnp.all(y_odd == x_odd))

    # Exercise the multi-chunk (concurrent DMA) path with a small tensor by
    # lowering the chunking threshold; last chunk is ragged on purpose.
    x_mc = jax.random.normal(key, (63, 1000), dtype=jnp.float32)
    y_mc = _materialized_copy(x_mc, min_chunk_bytes=64 * 1024, max_chunks=4)
    jax.block_until_ready(y_mc)
    assert y_mc.shape == x_mc.shape and y_mc.dtype == x_mc.dtype
    assert bool(jnp.all(y_mc == x_mc))

    print("KERNEL_OK")
</pallas_src>

<mosaic_0001>
module attributes {stable_mosaic.version = 11 : i64} {
  func.func @_identity_tile_kernel(%arg0: i32, %arg1: memref<2x1024xf32, #tpu.memory_space<vmem>>, %arg2: memref<2x1024xf32, #tpu.memory_space<vmem>>) attributes {dimension_semantics = [#tpu.dimension_semantics<parallel>], iteration_bounds = array<i64: 1>, scalar_prefetch = 0 : i64, scratch_operands = 0 : i64, tpu.core_type = #tpu.core_type<tc>, window_params = [{transform_indices = @transform_0, window_bounds = array<i64: 2, 1024>}, {transform_indices = @transform_1, window_bounds = array<i64: 2, 1024>}]} {
    %c0 = arith.constant 0 : index
    %c0_0 = arith.constant 0 : index
    %0 = vector.load %arg1[%c0, %c0_0] : memref<2x1024xf32, #tpu.memory_space<vmem>>, vector<2x1024xf32>
    %c0_1 = arith.constant 0 : index
    %c0_2 = arith.constant 0 : index
    %1 = vector.load %arg2[%c0_1, %c0_2] : memref<2x1024xf32, #tpu.memory_space<vmem>>, vector<2x1024xf32>
    tpu.vector_store %arg2[%c0_1, %c0_2], %0 {strides = array<i32>} : memref<2x1024xf32, #tpu.memory_space<vmem>>, vector<2x1024xf32>,
    return
  }
  func.func @transform_0(%arg0: i32) -> (i32, i32) {
    %c0_i32 = arith.constant 0 : i32
    %c0_i32_0 = arith.constant 0 : i32
    return %arg0, %c0_i32 : i32, i32
  }
  func.func @transform_1(%arg0: i32) -> (i32, i32) {
    %c0_i32 = arith.constant 0 : i32
    %c0_i32_0 = arith.constant 0 : i32
    return %arg0, %c0_i32 : i32, i32
  }
}

</mosaic_0001>

<bundles_post_ra>
// kernel: _tiled_passthrough.1
= control target key start
LH: loop header
LB: loop body
LE: loop exit
PB: predicated region body
PF: predicated region fallthrough
CT: control target
= control target key end

     0   :  { %s38_s0 = inlined_call_operand.vmem [shape: f32[2,1024], index: 0, kind: input, shape index: {}]   ;;  %s39_s1 = inlined_call_operand.vmem [shape: f32[2,1024], index: 1, kind: output, shape index: {}]  }
   0x1   :  { %v8_v0 = vld [vmem:[%s38_s0] sm:$0xff]  ;;  %v9_v1 = vld [vmem:[%s38_s0 + $0x8] sm:$0xff] }
   0x2   :  { %10 = vst [vmem:[%s39_s1] sm:$0xff] %v8_v0 }
   0x3   :  { %11 = vst [vmem:[%s39_s1 + $0x8] sm:$0xff] %v9_v1 }

</bundles_post_ra>
